<compile_context>
chip_gen: v7x
topology: tpu7x:2x2x1
jax: 0.10.0
libtpu: 0.0.40
codegen_flags: <defaults>
</compile_context>

<pallas_src>
import jax
import jax.numpy as jnp
from jax.experimental import pallas as pl
from jax.experimental.pallas import tpu as pltpu


def _round_up(x, m):
    return ((x + m - 1) // m) * m


def _mean_pool_kernel(emb_ref, mask_ref, out_ref, acc_ref, msum_ref):
    # emb_ref:  [TB, TS, TD]  (input dtype)
    # mask_ref: [TB, TS]      (float32; zero for real padding AND wrapper padding)
    # out_ref:  [TB, TD]      (float32; resident across the seq grid axis)
    # acc_ref:  [TB, TD] f32 scratch; msum_ref: [TB, 1] f32 scratch
    s = pl.program_id(2)

    @pl.when(s == 0)
    def _init():
        acc_ref[...] = jnp.zeros_like(acc_ref)
        msum_ref[...] = jnp.zeros_like(msum_ref)

    emb = emb_ref[...]
    mask = mask_ref[...]

    # Mask multiply in the input dtype (exact for a 0/1 mask), accumulate in f32.
    masked = emb * mask[:, :, None].astype(emb.dtype)
    acc_ref[...] += jnp.sum(masked.astype(jnp.float32), axis=1)
    # token count from the already-loaded mask tile
    msum_ref[...] += jnp.sum(mask, axis=1, keepdims=True)

    @pl.when(s == pl.num_programs(2) - 1)
    def _finalize():
        denom = jnp.maximum(msum_ref[...], 1e-9)  # torch.clamp(sum_mask, min=1e-9)
        out_ref[...] = (acc_ref[...] / denom).astype(out_ref.dtype)


def instructor_mean_pooling(token_embeddings, attention_mask):
    """Pallas-backed masked mean pooling.

    token_embeddings: [B, S, D] float (f32 or bf16)
    attention_mask:   [B, S]    int/float (1 = real token, 0 = padding)
    returns:          [B, D]    float32 sentence embedding
    """
    B, S, D = token_embeddings.shape
    assert attention_mask.shape == (B, S)
    itemsize = jnp.dtype(token_embeddings.dtype).itemsize

    # --- tile selection -----------------------------------------------------
    TB = 8                                   # sublane-aligned batch tile
    B_pad = _round_up(B, TB)

    D_pad = _round_up(D, 128)                # lane-dense output
    if D_pad <= 512:
        TD = D_pad
    else:
        TD = next(td for td in (512, 384, 256, 128) if D_pad % td == 0)

    # Keep each (double-buffered) embedding tile around ~2 MiB so the pipeline
    # fits comfortably in the scoped-VMEM default on v5e/v6e/v7x.
    ts = (2 * 1024 * 1024) // (TB * TD * itemsize)
    TS = max(128, (ts // 128) * 128)
    TS = min(TS, _round_up(S, 128))
    S_pad = _round_up(S, TS)

    # --- padding: padded tokens get mask 0, so they never contribute --------
    emb_p = jnp.pad(
        token_embeddings, ((0, B_pad - B), (0, S_pad - S), (0, D_pad - D))
    )
    mask_p = jnp.pad(
        attention_mask.astype(jnp.float32), ((0, B_pad - B), (0, S_pad - S))
    )

    grid = (B_pad // TB, D_pad // TD, S_pad // TS)

    out = pl.pallas_call(
        _mean_pool_kernel,
        out_shape=jax.ShapeDtypeStruct((B_pad, D_pad), jnp.float32),
        grid_spec=pltpu.PrefetchScalarGridSpec(
            num_scalar_prefetch=0,
            grid=grid,
            in_specs=[
                pl.BlockSpec((TB, TS, TD), lambda b, d, s: (b, s, d)),
                pl.BlockSpec((TB, TS), lambda b, d, s: (b, s)),
            ],
            out_specs=pl.BlockSpec((TB, TD), lambda b, d, s: (b, d)),
            scratch_shapes=[
                pltpu.VMEM((TB, TD), jnp.float32),
                pltpu.VMEM((TB, 1), jnp.float32),
            ],
        ),
        compiler_params=pltpu.CompilerParams(
            dimension_semantics=("parallel", "parallel", "arbitrary"),
        ),
    )(emb_p, mask_p)

    return out[:B, :D]


def instructor_pooling_forward(features):
    """Mirrors INSTRUCTOR_Pooling.forward for the default (mean) config."""
    token_embeddings = features["token_embeddings"]
    attention_mask = features["attention_mask"]
    sentence_embedding = instructor_mean_pooling(token_embeddings, attention_mask)
    features = dict(features)
    features["sentence_embedding"] = sentence_embedding
    return features


if __name__ == "__main__":
    key = jax.random.PRNGKey(0)
    B, S, D = 2, 8, 32

    k_emb, _ = jax.random.split(key)
    token_embeddings = jax.random.normal(k_emb, (B, S, D), dtype=jnp.float32)

    # batch 0: all 8 tokens valid; batch 1: only first 5 tokens valid
    attention_mask = jnp.array(
        [[1, 1, 1, 1, 1, 1, 1, 1],
         [1, 1, 1, 1, 1, 0, 0, 0]],
        dtype=jnp.int32,
    )

    features = {
        "token_embeddings": token_embeddings,
        "attention_mask": attention_mask,
    }

    out_features = instructor_pooling_forward(features)
    sent_emb = jax.block_until_ready(out_features["sentence_embedding"])

    # plain-JAX reference check
    mask_f = attention_mask.astype(jnp.float32)[:, :, None]
    ref = jnp.sum(token_embeddings * mask_f, axis=1) / jnp.maximum(
        jnp.sum(mask_f, axis=1), 1e-9
    )
    assert sent_emb.shape == (B, D)
    assert jnp.allclose(sent_emb, ref, atol=1e-5, rtol=1e-5)

    print("KERNEL_OK")
</pallas_src>

<mosaic_0001>
module attributes {stable_mosaic.version = 11 : i64} {
  func.func @_mean_pool_kernel(%arg0: i32, %arg1: i32, %arg2: i32, %arg3: memref<8x128x128xf32, #tpu.memory_space<vmem>>, %arg4: memref<8x128xf32, #tpu.memory_space<vmem>>, %arg5: memref<8x128xf32, #tpu.memory_space<vmem>>, %arg6: memref<8x128xf32, #tpu.memory_space<vmem>>, %arg7: memref<8x1xf32, #tpu.memory_space<vmem>>) attributes {dimension_semantics = [#tpu.dimension_semantics<parallel>, #tpu.dimension_semantics<parallel>, #tpu.dimension_semantics<arbitrary>], iteration_bounds = array<i64: 1, 1, 1>, scalar_prefetch = 0 : i64, scratch_operands = 2 : i64, tpu.core_type = #tpu.core_type<tc>, window_params = [{transform_indices = @transform_0, window_bounds = array<i64: 8, 128, 128>}, {transform_indices = @transform_1, window_bounds = array<i64: 8, 128>}, {transform_indices = @transform_2, window_bounds = array<i64: 8, 128>}]} {
    %c0_i32 = arith.constant 0 : i32
    %0 = arith.cmpi eq, %arg2, %c0_i32 : i32
    %1 = arith.extui %0 : i1 to i32
    %c0_i32_0 = arith.constant 0 : i32
    %2 = arith.cmpi ne, %1, %c0_i32_0 : i32
    scf.if %2 {
      %cst_16 = arith.constant 0.000000e+00 : f32
      %20 = vector.broadcast %cst_16 : f32 to vector<8x128xf32>
      %c0_17 = arith.constant 0 : index
      %c0_18 = arith.constant 0 : index
      %21 = vector.load %arg6[%c0_17, %c0_18] : memref<8x128xf32, #tpu.memory_space<vmem>>, vector<8x128xf32>
      tpu.vector_store %arg6[%c0_17, %c0_18], %20 {strides = array<i32>} : memref<8x128xf32, #tpu.memory_space<vmem>>, vector<8x128xf32>,
      %cst_19 = arith.constant 0.000000e+00 : f32
      %22 = vector.broadcast %cst_19 : f32 to vector<8x1xf32>
      %c0_20 = arith.constant 0 : index
      %c0_21 = arith.constant 0 : index
      %23 = vector.load %arg7[%c0_20, %c0_21] : memref<8x1xf32, #tpu.memory_space<vmem>>, vector<8x1xf32>
      tpu.vector_store %arg7[%c0_20, %c0_21], %22 {strides = array<i32>} : memref<8x1xf32, #tpu.memory_space<vmem>>, vector<8x1xf32>,
    } else {
    }
    %c0 = arith.constant 0 : index
    %c0_1 = arith.constant 0 : index
    %c0_2 = arith.constant 0 : index
    %3 = vector.load %arg3[%c0, %c0_1, %c0_2] : memref<8x128x128xf32, #tpu.memory_space<vmem>>, vector<8x128x128xf32>
    %c0_3 = arith.constant 0 : index
    %c0_4 = arith.constant 0 : index
    %4 = vector.load %arg4[%c0_3, %c0_4] : memref<8x128xf32, #tpu.memory_space<vmem>>, vector<8x128xf32>
    %5 = vector.shape_cast %4 : vector<8x128xf32> to vector<8x128x1xf32>
    %6 = vector.broadcast %5 : vector<8x128x1xf32> to vector<8x128x128xf32>
    %7 = arith.mulf %3, %6 : vector<8x128x128xf32>
    %c0_5 = arith.constant 0 : index
    %c0_6 = arith.constant 0 : index
    %8 = vector.load %arg6[%c0_5, %c0_6] : memref<8x128xf32, #tpu.memory_space<vmem>>, vector<8x128xf32>
    %cst = arith.constant dense<0.000000e+00> : vector<8x128xf32>
    %9 = vector.multi_reduction <add>, %7, %cst [1] : vector<8x128x128xf32> to vector<8x128xf32>
    %10 = arith.addf %8, %9 : vector<8x128xf32>
    %c0_7 = arith.constant 0 : index
    %c0_8 = arith.constant 0 : index
    %11 = vector.load %arg6[%c0_7, %c0_8] : memref<8x128xf32, #tpu.memory_space<vmem>>, vector<8x128xf32>
    tpu.vector_store %arg6[%c0_7, %c0_8], %10 {strides = array<i32>} : memref<8x128xf32, #tpu.memory_space<vmem>>, vector<8x128xf32>,
    %c0_9 = arith.constant 0 : index
    %c0_10 = arith.constant 0 : index
    %12 = vector.load %arg7[%c0_9, %c0_10] : memref<8x1xf32, #tpu.memory_space<vmem>>, vector<8x1xf32>
    %cst_11 = arith.constant dense<0.000000e+00> : vector<8xf32>
    %13 = vector.multi_reduction <add>, %4, %cst_11 [1] : vector<8x128xf32> to vector<8xf32>
    %14 = vector.shape_cast %13 : vector<8xf32> to vector<8x1xf32>
    %15 = arith.addf %12, %14 : vector<8x1xf32>
    %c0_12 = arith.constant 0 : index
    %c0_13 = arith.constant 0 : index
    %16 = vector.load %arg7[%c0_12, %c0_13] : memref<8x1xf32, #tpu.memory_space<vmem>>, vector<8x1xf32>
    tpu.vector_store %arg7[%c0_12, %c0_13], %15 {strides = array<i32>} : memref<8x1xf32, #tpu.memory_space<vmem>>, vector<8x1xf32>,
    %c0_i32_14 = arith.constant 0 : i32
    %17 = arith.cmpi eq, %arg2, %c0_i32_14 : i32
    %18 = arith.extui %17 : i1 to i32
    %c0_i32_15 = arith.constant 0 : i32
    %19 = arith.cmpi ne, %18, %c0_i32_15 : i32
    scf.if %19 {
      %c0_16 = arith.constant 0 : index
      %c0_17 = arith.constant 0 : index
      %20 = vector.load %arg7[%c0_16, %c0_17] : memref<8x1xf32, #tpu.memory_space<vmem>>, vector<8x1xf32>
      %cst_18 = arith.constant 9.99999971E-10 : f32
      %21 = vector.broadcast %cst_18 : f32 to vector<8x1xf32>
      %22 = arith.maximumf %20, %21 : vector<8x1xf32>
      %c0_19 = arith.constant 0 : index
      %c0_20 = arith.constant 0 : index
      %23 = vector.load %arg6[%c0_19, %c0_20] : memref<8x128xf32, #tpu.memory_space<vmem>>, vector<8x128xf32>
      %24 = vector.broadcast %22 : vector<8x1xf32> to vector<8x128xf32>
      %25 = arith.divf %23, %24 : vector<8x128xf32>
      %c0_21 = arith.constant 0 : index
      %c0_22 = arith.constant 0 : index
      %26 = vector.load %arg5[%c0_21, %c0_22] : memref<8x128xf32, #tpu.memory_space<vmem>>, vector<8x128xf32>
      tpu.vector_store %arg5[%c0_21, %c0_22], %25 {strides = array<i32>} : memref<8x128xf32, #tpu.memory_space<vmem>>, vector<8x128xf32>,
    } else {
    }
    return
  }
  func.func @transform_0(%arg0: i32, %arg1: i32, %arg2: i32) -> (i32, i32, i32) {
    %c0_i32 = arith.constant 0 : i32
    return %arg0, %arg2, %arg1 : i32, i32, i32
  }
  func.func @transform_1(%arg0: i32, %arg1: i32, %arg2: i32) -> (i32, i32) {
    %c0_i32 = arith.constant 0 : i32
    return %arg0, %arg2 : i32, i32
  }
  func.func @transform_2(%arg0: i32, %arg1: i32, %arg2: i32) -> (i32, i32) {
    %c0_i32 = arith.constant 0 : i32
    return %arg0, %arg1 : i32, i32
  }
}

</mosaic_0001>

<bundles_post_ra>
// kernel: tpu_custom_call.1
= control target key start
LH: loop header
LB: loop body
LE: loop exit
PB: predicated region body
PF: predicated region fallthrough
CT: control target
= control target key end

     0   :  { %7 = vsyncpa [#allocation5], 0  ;;  %s1432_s0 = inlined_call_operand.hbm [shape: f32[8,128,128], index: 0, kind: input, shape index: {}]   ;;  %s1433_s1 = inlined_call_operand.hbm [shape: f32[8,128], index: 1, kind: input, shape index: {}]   ;;  %s1434_s2 = inlined_call_operand.hbm [shape: f32[8,128], index: 2, kind: output, shape index: {}]  }
   0x1   :  { %8 = vsyncpa [#allocation8], 0 }
   0x2   :  { %9 = vsyncpa [#allocation6], 0  ;;  %s1150_s9 = smov [#allocation4]   ;;  %s1078_s13 = scalar_lea.hbm %s1432_s0, 16384 }
   0x3   :  { %s15_s10 = sshll.u32 %s1150_s9, 4  ;;  %p1079_p0 = scmp.ne.s32.totalorder %s1432_s0, %s1078_s13  ;;  %s16_s10 = int_to_ptr.vmem [resolvable:$true] %s15_s10 }
   0x4   :  { %p1082_p1 = scmp.lt.u32.totalorder %s1078_s13, %s1432_s0 }
   0x6   :  { %p1084_p2 = pnand %p1082_p1, %p1079_p0 }
   0x8   :  { %1087 = shalt.err (!%p1084_p2)
}
   0x9   :  { %s1088_s18 = scalar_lea.vmem %s16_s10, 16384  ;;  %p1093_p4 = scmp.lt.s32.totalorder %s16_s10, %s16_s10 }
   0xa   :  { %p1089_p3 = scmp.ne.s32.totalorder %s16_s10, %s1088_s18  ;;  %p1094_p5 = scmp.lt.s32.totalorder %s1088_s18, %s1088_s18 }
   0xc   :  { %p1095_p6 = por %p1094_p5, %p1093_p4 }
   0xe   :  { %p1096_p7 = pnand %p1095_p6, %p1089_p3 }
  0x10   :  { %1099 = shalt.err (!%p1096_p7)
}
  0x11   :  { %s1151_s19 = smov 128   ;;  %s1152_s20 = smov 8  }
  0x12   :  { %21 = dma.hbm_to_vmem [thread:$0]  %s1432_s0, 16384, %s16_s10, [#allocation5], %s1151_s19, %s1151_s19, %s1152_s20  }
  0x13   :  { %s1153_s23 = smov [#allocation7]   ;;  %s1100_s27 = scalar_lea.hbm %s1433_s1, 128 }
  0x14   :  { %s28_s24 = sshll.u32 %s1153_s23, 4  ;;  %p1101_p8 = scmp.ne.s32.totalorder %s1433_s1, %s1100_s27  ;;  %s29_s24 = int_to_ptr.vmem [resolvable:$true] %s28_s24 }
  0x15   :  { %p1104_p9 = scmp.lt.u32.totalorder %s1100_s27, %s1433_s1 }
  0x17   :  { %p1106_p10 = pnand %p1104_p9, %p1101_p8 }
  0x19   :  { %1109 = shalt.err (!%p1106_p10)
}
  0x1a   :  { %s1110_s4 = scalar_lea.vmem %s29_s24, 128  ;;  %p1115_p12 = scmp.lt.s32.totalorder %s29_s24, %s29_s24 }
  0x1b   :  { %p1111_p11 = scmp.ne.s32.totalorder %s29_s24, %s1110_s4  ;;  %p1116_p13 = scmp.lt.s32.totalorder %s1110_s4, %s1110_s4 }
  0x1d   :  { %p1117_p0 = por %p1116_p13, %p1115_p12 }
  0x1f   :  { %p1118_p1 = pnand %p1117_p0, %p1111_p11 }
  0x21   :  { %1121 = shalt.err (!%p1118_p1)
}
  0x22   :  { %31 = dma.hbm_to_vmem [thread:$0]  %s1433_s1, 128, %s29_s24, [#allocation8]  }
  0x23   :  { %1144 = dma.done.wait [#allocation5], 16384  }
  0x24   :  { %1145 = vsyncadd [#allocation5], 4294950912 }
  0x25   :  { %1146 = dma.done.wait [#allocation8], 128  }
  0x26   :  { %1147 = vsyncadd [#allocation8], 4294967168  ;;  %v174_v0 = vlaneseq  ;;  %v1199_v3 = vld [vmem:[#allocation7] sm:$0xff]  ;;  %v46_v25 = vld [vmem:[#allocation4 + $0x8] sm:$0xff]  ;;  %vm43_vm0 = vcmask 7168   ;;  %vm1015_vm1 = vcmask 1041409  }
  0x27   :  { %v45_v26 = vld [vmem:[#allocation4] sm:$0xff]  ;;  %v47_v30 = vld [vmem:[#allocation4 + $0x10] sm:$0xff]  ;;  %v48_v36 = vld [vmem:[#allocation4 + $0x18] sm:$0xff]  ;;  %vm1017_vm2 = vcmask 1042434   ;;  %vm1019_vm3 = vcmask 1043459   ;;  %vm1021_vm4 = vcmask 1044484  }
  0x28   :  { %v1196_v1 = vshrl.u32 %v174_v0, 7  ;;  %v62_v37 = vld [vmem:[#allocation4 + $0x88] sm:$0xff]  ;;  %v61_v38 = vld [vmem:[#allocation4 + $0x80] sm:$0xff]  ;;  %v64_v45 = vld [vmem:[#allocation4 + $0x98] sm:$0xff]  ;;  %vm1023_vm5 = vcmask 1045509   ;;  %vm1025_vm6 = vcmask 1046534  }
  0x29   :  { %v63_v46 = vld [vmem:[#allocation4 + $0x90] sm:$0xff]  ;;  %v49_v47 = vld [vmem:[#allocation4 + $0x20] sm:$0xff]  ;;  %v50_v51 = vld [vmem:[#allocation4 + $0x28] sm:$0xff]  ;;  %vm1027_vm7 = vcmask 1047559   ;;  %s1156_s1 = smov [#allocation9]  }
  0x2a   :  { %v176_v2 = vsub.s32 0, %v1196_v1  ;;  %v243_v5 = vsub.s32 1, %v1196_v1  ;;  %v310_v7 = vsub.s32 2, %v1196_v1  ;;  %v377_v9 = vsub.s32 3, %v1196_v1  ;;  %v66_v56 = vld [vmem:[#allocation4 + $0xa8] sm:$0xff]  ;;  %v65_v57 = vld [vmem:[#allocation4 + $0xa0] sm:$0xff] }
  0x2b   :  { %v444_v15 = vsub.s32 4, %v1196_v1  ;;  %s1058_s6 = sshll.u32 %s1156_s1, 4  ;;  %s1059_s6 = int_to_ptr.vmem [resolvable:$true] %s1058_s6 }
  0x2c   :  { %v177_v4 = vrot.slane %v1199_v3, %v176_v2  ;;  %v244_v6 = vrot.slane %v1199_v3, %v243_v5  ;;  %v311_v8 = vrot.slane %v1199_v3, %v310_v7  ;;  %v378_v10 = vrot.slane %v1199_v3, %v377_v9  ;;  %v67_v5 = vld [vmem:[#allocation4 + $0xb0] sm:$0xff]  ;;  %s1122_s7 = scalar_lea.vmem %s1059_s6, 128  ;;  %p1127_p3 = scmp.lt.s32.totalorder %s1059_s6, %s1059_s6 }
  0x2d   :  { %v1210_v18 = vrot.slane %v1199_v3, %v444_v15  ;;  %p1123_p2 = scmp.ne.s32.totalorder %s1059_s6, %s1122_s7  ;;  %p1128_p4 = scmp.lt.s32.totalorder %s1122_s7, %s1122_s7 }
  0x2e   :  { %187 = vbcast.lane.b32.xlu1 %v177_v4, 272  ;;  %179 = vbcast.lane.b32.xlu0 %v177_v4, 256 }
  0x2f   :  { %p1129_p5 = por %p1128_p4, %p1127_p3 }
  0x31   :  { %p1130_p6 = pnand %p1129_p5, %p1123_p2 }
  0x32   :  { %191 = vbcast.lane.b32.xlu1 %v177_v4, 280  ;;  %183 = vbcast.lane.b32.xlu0 %v177_v4, 264 }
  0x36   :  { %199 = vbcast.lane.b32.xlu1 %v177_v4, 296  ;;  %195 = vbcast.lane.b32.xlu0 %v177_v4, 288 }
  0x3a   :  { %207 = vbcast.lane.b32.xlu1 %v177_v4, 312  ;;  %203 = vbcast.lane.b32.xlu0 %v177_v4, 304 }
  0x3e   :  { %215 = vbcast.lane.b32.xlu1 %v177_v4, 328  ;;  %211 = vbcast.lane.b32.xlu0 %v177_v4, 320 }
  0x42   :  { %223 = vbcast.lane.b32.xlu1 %v177_v4, 344  ;;  %219 = vbcast.lane.b32.xlu0 %v177_v4, 336 }
  0x46   :  { %231 = vbcast.lane.b32.xlu1 %v177_v4, 360  ;;  %227 = vbcast.lane.b32.xlu0 %v177_v4, 352 }
  0x4a   :  { %239 = vbcast.lane.b32.xlu1 %v177_v4, 376  ;;  %235 = vbcast.lane.b32.xlu0 %v177_v4, 368  ;;  %v68_v4 = vld [vmem:[#allocation4 + $0xb8] sm:$0xff] }
  0x4e   :  { %250 = vbcast.lane.b32.xlu1 %v244_v6, 264  ;;  %246 = vbcast.lane.b32.xlu0 %v244_v6, 256 }
  0x52   :  { %258 = vbcast.lane.b32.xlu1 %v244_v6, 280  ;;  %254 = vbcast.lane.b32.xlu0 %v244_v6, 272 }
  0x56   :  { %266 = vbcast.lane.b32.xlu1 %v244_v6, 296  ;;  %262 = vbcast.lane.b32.xlu0 %v244_v6, 288 }
  0x5a   :  { %274 = vbcast.lane.b32.xlu1 %v244_v6, 312  ;;  %270 = vbcast.lane.b32.xlu0 %v244_v6, 304 }
  0x5e   :  { %282 = vbcast.lane.b32.xlu1 %v244_v6, 328  ;;  %278 = vbcast.lane.b32.xlu0 %v244_v6, 320 }
  0x62   :  { %290 = vbcast.lane.b32.xlu1 %v244_v6, 344  ;;  %286 = vbcast.lane.b32.xlu0 %v244_v6, 336 }
  0x66   :  { %298 = vbcast.lane.b32.xlu1 %v244_v6, 360  ;;  %294 = vbcast.lane.b32.xlu0 %v244_v6, 352 }
  0x6a   :  { %306 = vbcast.lane.b32.xlu1 %v244_v6, 376  ;;  %302 = vbcast.lane.b32.xlu0 %v244_v6, 368  ;;  %v51_v6 = vld [vmem:[#allocation4 + $0x30] sm:$0xff] }
  0x6e   :  { %317 = vbcast.lane.b32.xlu1 %v311_v8, 264  ;;  %313 = vbcast.lane.b32.xlu0 %v311_v8, 256 }
  0x72   :  { %325 = vbcast.lane.b32.xlu1 %v311_v8, 280  ;;  %321 = vbcast.lane.b32.xlu0 %v311_v8, 272 }
  0x76   :  { %333 = vbcast.lane.b32.xlu1 %v311_v8, 296  ;;  %329 = vbcast.lane.b32.xlu0 %v311_v8, 288 }
  0x7a   :  { %341 = vbcast.lane.b32.xlu1 %v311_v8, 312  ;;  %337 = vbcast.lane.b32.xlu0 %v311_v8, 304 }
  0x7e   :  { %349 = vbcast.lane.b32.xlu1 %v311_v8, 328  ;;  %345 = vbcast.lane.b32.xlu0 %v311_v8, 320 }
  0x82   :  { %357 = vbcast.lane.b32.xlu1 %v311_v8, 344  ;;  %353 = vbcast.lane.b32.xlu0 %v311_v8, 336 }
  0x86   :  { %365 = vbcast.lane.b32.xlu1 %v311_v8, 360  ;;  %361 = vbcast.lane.b32.xlu0 %v311_v8, 352 }
  0x8a   :  { %373 = vbcast.lane.b32.xlu1 %v311_v8, 376  ;;  %369 = vbcast.lane.b32.xlu0 %v311_v8, 368 }
  0x8e   :  { %384 = vbcast.lane.b32.xlu1 %v378_v10, 264  ;;  %380 = vbcast.lane.b32.xlu0 %v378_v10, 256 }
  0x92   :  { %392 = vbcast.lane.b32.xlu1 %v378_v10, 280  ;;  %388 = vbcast.lane.b32.xlu0 %v378_v10, 272 }
  0x96   :  { %400 = vbcast.lane.b32.xlu1 %v378_v10, 296  ;;  %396 = vbcast.lane.b32.xlu0 %v378_v10, 288 }
  0x9a   :  { %408 = vbcast.lane.b32.xlu1 %v378_v10, 312  ;;  %404 = vbcast.lane.b32.xlu0 %v378_v10, 304 }
  0x9e   :  { %416 = vbcast.lane.b32.xlu1 %v378_v10, 328  ;;  %412 = vbcast.lane.b32.xlu0 %v378_v10, 320 }
  0xa0   :  { %v188_v11 = vpop.permute.xlu1 %187  ;;  %v180_v12 = vpop.permute.xlu0 %179 }
  0xa1   :  { %v710_v31 = vmul.f32 %v180_v12, %v45_v26  ;;  %v712_v32 = vmul.f32 %v188_v11, %v47_v30  ;;  %v52_v11 = vld [vmem:[#allocation4 + $0x38] sm:$0xff] }
  0xa2   :  { %424 = vbcast.lane.b32.xlu1 %v378_v10, 344  ;;  %420 = vbcast.lane.b32.xlu0 %v378_v10, 336 }
  0xa4   :  { %v192_v13 = vpop.permute.xlu1 %191  ;;  %v184_v14 = vpop.permute.xlu0 %183 }
  0xa5   :  { %v711_v27 = vmul.f32 %v184_v14, %v46_v25  ;;  %v713_v39 = vmul.f32 %v192_v13, %v48_v36 }
  0xa6   :  { %432 = vbcast.lane.b32.xlu1 %v378_v10, 360  ;;  %428 = vbcast.lane.b32.xlu0 %v378_v10, 352 }
  0xa7   :  { %v839_v33 = vadd.f32 %v711_v27, %v710_v31 }
  0xa8   :  { %v200_v16 = vpop.permute.xlu1 %199  ;;  %v196_v17 = vpop.permute.xlu0 %195 }
  0xa9   :  { %v840_v40 = vadd.f32 %v839_v33, %v712_v32  ;;  %v714_v55 = vmul.f32 %v196_v17, %v49_v47  ;;  %v715_v59 = vmul.f32 %v200_v16, %v50_v51  ;;  %v70_v16 = vld [vmem:[#allocation4 + $0xc8] sm:$0xff]  ;;  %v69_v17 = vld [vmem:[#allocation4 + $0xc0] sm:$0xff] }
  0xaa   :  { %440 = vbcast.lane.b32.xlu1 %v378_v10, 376  ;;  %436 = vbcast.lane.b32.xlu0 %v378_v10, 368 }
  0xab   :  { %v841_v48 = vadd.f32 %v840_v40, %v713_v39  ;;  %v53_v39 = vld [vmem:[#allocation4 + $0x40] sm:$0xff]  ;;  %v1154_v40 = vmov 0.0  }
  0xac   :  { %v1212_v19 = vpop.permute.xlu1 %207  ;;  %v1214_v20 = vpop.permute.xlu0 %203  ;;  %44 = vst.msk [vmem:[#allocation3] sm:$0xff] %vm43_vm0, %v1154_v40 }
  0xad   :  { %v842_v60 = vadd.f32 %v841_v48, %v714_v55  ;;  %v716_v15 = vmul.f32 %v1214_v20, %v51_v6  ;;  %v717_v26 = vmul.f32 %v1212_v19, %v52_v11  ;;  %v54_v19 = vld [vmem:[#allocation4 + $0x48] sm:$0xff]  ;;  %v511_v6 = vsub.s32 5, %v1196_v1 }
  0xae   :  { %451 = vbcast.lane.b32.xlu1 %v1210_v18, 264  ;;  %447 = vbcast.lane.b32.xlu0 %v1210_v18, 256  ;;  %v74_v48 = vld [vmem:[#allocation4 + $0xe8] sm:$0xff] }
  0xaf   :  { %v843_v8 = vadd.f32 %v842_v60, %v715_v59  ;;  %v55_v59 = vld [vmem:[#allocation4 + $0x50] sm:$0xff] }
  0xb0   :  { %v1218_v21 = vpop.permute.xlu1 %215  ;;  %v1220_v22 = vpop.permute.xlu0 %211 }
  0xb1   :  { %v844_v27 = vadd.f32 %v843_v8, %v716_v15  ;;  %v718_v47 = vmul.f32 %v1220_v22, %v53_v39  ;;  %v719_v51 = vmul.f32 %v1218_v21, %v54_v19  ;;  %v79_v15 = vld [vmem:[#allocation4 + $0x110] sm:$0xff]  ;;  %v1155_v39 = vmov 0  }
  0xb2   :  { %455 = vbcast.lane.b32.xlu1 %v1210_v18, 272  ;;  %1075 = vset.pattern.permute.xlu0 %v1155_v39 }
  0xb4   :  { %v1223_v23 = vpop.permute.xlu1 %223  ;;  %v1225_v24 = vpop.permute.xlu0 %219 }
  0xb5   :  { %v720_v21 = vmul.f32 %v1225_v24, %v55_v59  ;;  %v1261_v24 = vrot.slane %v1199_v3, %v511_v6  ;;  %v85_v59 = vld [vmem:[#allocation4 + $0x140] sm:$0xff] }
  0xb6   :  { %459 = vbcast.lane.b32.xlu1 %v1210_v18, 280 }
  0xb8   :  { %v1228_v28 = vpop.permute.xlu1 %231  ;;  %v1230_v29 = vpop.permute.xlu0 %227 }
  0xba   :  { %463 = vbcast.lane.b32.xlu1 %v1210_v18, 288 }
  0xbc   :  { %v1233_v34 = vpop.permute.xlu1 %239  ;;  %v1235_v35 = vpop.permute.xlu0 %235 }
  0xbe   :  { %467 = vbcast.lane.b32.xlu1 %v1210_v18, 296 }
  0xc0   :  { %v251_v41 = vpop.permute.xlu1 %250  ;;  %v247_v42 = vpop.permute.xlu0 %246 }
  0xc1   :  { %v727_v43 = vmul.f32 %v251_v41, %v62_v37  ;;  %v726_v44 = vmul.f32 %v247_v42, %v61_v38  ;;  %v72_v37 = vld [vmem:[#allocation4 + $0xd8] sm:$0xff]  ;;  %v71_v38 = vld [vmem:[#allocation4 + $0xd0] sm:$0xff]  ;;  %v845_v41 = vadd.f32 %v844_v27, %v717_v26  ;;  %v58_v27 = vld [vmem:[#allocation4 + $0x68] sm:$0xff] }
  0xc2   :  { %471 = vbcast.lane.b32.xlu1 %v1210_v18, 304 }
  0xc3   :  { %v860_v52 = vadd.f32 %v727_v43, %v726_v44 }
  0xc4   :  { %v259_v49 = vpop.permute.xlu1 %258  ;;  %v255_v50 = vpop.permute.xlu0 %254 }
  0xc5   :  { %v729_v53 = vmul.f32 %v259_v49, %v64_v45  ;;  %v728_v54 = vmul.f32 %v255_v50, %v63_v46  ;;  %v73_v49 = vld [vmem:[#allocation4 + $0xe0] sm:$0xff] }
  0xc6   :  { %475 = vbcast.lane.b32.xlu1 %v1210_v18, 312 }
  0xc7   :  { %v861_v58 = vadd.f32 %v860_v52, %v728_v54  ;;  %v846_v52 = vadd.f32 %v845_v41, %v718_v47  ;;  %v59_v47 = vld [vmem:[#allocation4 + $0x70] sm:$0xff] }
  0xc8   :  { %v267_v61 = vpop.permute.xlu1 %266  ;;  %v263_v62 = vpop.permute.xlu0 %262 }
  0xc9   :  { %v731_v63 = vmul.f32 %v267_v61, %v66_v56  ;;  %v730_v0 = vmul.f32 %v263_v62, %v65_v57  ;;  %v862_v2 = vadd.f32 %v861_v58, %v729_v53  ;;  %v75_v58 = vld [vmem:[#allocation4 + $0xf0] sm:$0xff]  ;;  %v847_v61 = vadd.f32 %v846_v52, %v719_v51  ;;  %v60_v52 = vld [vmem:[#allocation4 + $0x78] sm:$0xff] }
  0xca   :  { %479 = vbcast.lane.b32.xlu1 %v1210_v18, 320 }
  0xcb   :  { %v863_v7 = vadd.f32 %v862_v2, %v730_v0 }
  0xcc   :  { %v275_v9 = vpop.permute.xlu1 %274  ;;  %v271_v10 = vpop.permute.xlu0 %270 }
  0xcd   :  { %v733_v12 = vmul.f32 %v275_v9, %v68_v4  ;;  %v732_v13 = vmul.f32 %v271_v10, %v67_v5  ;;  %v864_v14 = vadd.f32 %v863_v7, %v731_v63  ;;  %1033 = vadd.xlane.f32.xlu0 %v1199_v3  ;;  %v56_v63 = vld [vmem:[#allocation4 + $0x58] sm:$0xff]  ;;  %v78_v4 = vld [vmem:[#allocation4 + $0x108] sm:$0xff]  ;;  %v77_v5 = vld [vmem:[#allocation4 + $0x100] sm:$0xff]  ;;  %v848_v9 = vadd.f32 %v847_v61, %v720_v21 }
  0xce   :  { %483 = vbcast.lane.b32.xlu1 %v1210_v18, 328  ;;  %v721_v8 = vmul.f32 %v1223_v23, %v56_v63  ;;  %v725_v61 = vmul.f32 %v1233_v34, %v60_v52 }
  0xcf   :  { %v865_v25 = vadd.f32 %v864_v14, %v732_v13  ;;  %v80_v14 = vld [vmem:[#allocation4 + $0x118] sm:$0xff] }
  0xd0   :  { %v283_v30 = vpop.permute.xlu1 %282  ;;  %v279_v31 = vpop.permute.xlu0 %278 }
  0xd1   :  { %v735_v32 = vmul.f32 %v283_v30, %v70_v16  ;;  %v734_v33 = vmul.f32 %v279_v31, %v69_v17  ;;  %v866_v36 = vadd.f32 %v865_v25, %v733_v12  ;;  %v578_v16 = vsub.s32 6, %v1196_v1  ;;  %v57_v17 = vld [vmem:[#allocation4 + $0x60] sm:$0xff] }
  0xd2   :  { %491 = vbcast.lane.b32.xlu1 %v1210_v18, 344  ;;  %v849_v25 = vadd.f32 %v848_v9, %v721_v8 }
  0xd3   :  { %v867_v20 = vadd.f32 %v866_v36, %v734_v33  ;;  %v722_v33 = vmul.f32 %v1230_v29, %v57_v17  ;;  %v82_v36 = vld [vmem:[#allocation4 + $0x128] sm:$0xff] }
  0xd4   :  { %v291_v42 = vpop.permute.xlu1 %290  ;;  %v287_v43 = vpop.permute.xlu0 %286 }
  0xd5   :  { %v737_v44 = vmul.f32 %v291_v42, %v72_v37  ;;  %v736_v45 = vmul.f32 %v287_v43, %v71_v38  ;;  %v868_v46 = vadd.f32 %v867_v20, %v735_v32  ;;  %v81_v37 = vld [vmem:[#allocation4 + $0x120] sm:$0xff]  ;;  %v1268_v38 = vrot.slane %v1199_v3, %v578_v16 }
  0xd6   :  { %495 = vbcast.lane.b32.xlu1 %v1210_v18, 352  ;;  %v850_v40 = vadd.f32 %v849_v25, %v722_v33 }
  0xd7   :  { %v869_v50 = vadd.f32 %v868_v46, %v736_v45  ;;  %v84_v45 = vld [vmem:[#allocation4 + $0x138] sm:$0xff]  ;;  %v83_v46 = vld [vmem:[#allocation4 + $0x130] sm:$0xff] }
  0xd8   :  { %v299_v53 = vpop.permute.xlu1 %298  ;;  %v295_v54 = vpop.permute.xlu0 %294 }
  0xd9   :  { %v739_v55 = vmul.f32 %v299_v53, %v74_v48  ;;  %v738_v56 = vmul.f32 %v295_v54, %v73_v49  ;;  %v870_v57 = vadd.f32 %v869_v50, %v737_v44  ;;  %v645_v44 = vsub.s32 7, %v1196_v1  ;;  %v76_v48 = vld [vmem:[#allocation4 + $0xf8] sm:$0xff] }
  0xda   :  { %499 = vbcast.lane.b32.xlu1 %v1210_v18, 360  ;;  %v724_v1 = vmul.f32 %v1235_v35, %v59_v47  ;;  %v88_v35 = vld [vmem:[#allocation4 + $0x158] sm:$0xff] }
  0xdb   :  { %v871_v60 = vadd.f32 %v870_v57, %v738_v56  ;;  %v1276_v56 = vrot.slane %v1199_v3, %v645_v44 }
  0xdc   :  { %v1251_v22 = vpop.permute.xlu1 %306  ;;  %v303_v62 = vpop.permute.xlu0 %302 }
  0xdd   :  { %v740_v0 = vmul.f32 %v303_v62, %v75_v58  ;;  %v872_v2 = vadd.f32 %v871_v60, %v739_v55  ;;  %v741_v57 = vmul.f32 %v1251_v22, %v76_v48  ;;  %v86_v58 = vld [vmem:[#allocation4 + $0x148] sm:$0xff] }
  0xde   :  { %503 = vbcast.lane.b32.xlu1 %v1210_v18, 368 }
  0xdf   :  { %v1256_v7 = vadd.f32 %v872_v2, %v740_v0 }
  0xe0   :  { %v318_v10 = vpop.permute.xlu1 %317  ;;  %v314_v11 = vpop.permute.xlu0 %313 }
  0xe1   :  { %v743_v12 = vmul.f32 %v318_v10, %v78_v4  ;;  %v742_v13 = vmul.f32 %v314_v11, %v77_v5  ;;  %v874_v4 = vadd.f32 %v1256_v7, %v741_v57  ;;  %v87_v5 = vld [vmem:[#allocation4 + $0x150] sm:$0xff] }
  0xe2   :  { %507 = vbcast.lane.b32.xlu1 %v1210_v18, 376 }
  0xe3   :  { %487 = vbcast.lane.b32.xlu0 %v1210_v18, 336  ;;  %v881_v30 = vadd.f32 %v743_v12, %v742_v13  ;;  %v723_v18 = vmul.f32 %v1228_v28, %v58_v27  ;;  %v875_v12 = vrot.slane %v874_v4, 4  ;;  %v90_v13 = vld [vmem:[#allocation4 + $0x168] sm:$0xff] }
  0xe4   :  { %v326_v26 = vpop.permute.xlu1 %325  ;;  %v322_v23 = vpop.permute.xlu0 %321 }
  0xe5   :  { %v745_v31 = vmul.f32 %v326_v26, %v80_v14  ;;  %v744_v32 = vmul.f32 %v322_v23, %v79_v15  ;;  %v851_v50 = vadd.f32 %v850_v40, %v723_v18  ;;  %v89_v14 = vld [vmem:[#allocation4 + $0x160] sm:$0xff]  ;;  %v876_v27 = vadd.f32 %v875_v12, %v874_v4 }
  0xe6   :  { %514 = vbcast.lane.b32.xlu1 %v1261_v24, 256 }
  0xe7   :  { %v882_v20 = vadd.f32 %v881_v30, %v744_v32  ;;  %518 = vbcast.lane.b32.xlu0 %v1261_v24, 264  ;;  %v852_v62 = vadd.f32 %v851_v50, %v724_v1  ;;  %v92_v30 = vld [vmem:[#allocation4 + $0x178] sm:$0xff]  ;;  %v877_v40 = vrot.slane %v876_v27, 2  ;;  %v95_v50 = vld [vmem:[#allocation4 + $0x190] sm:$0xff] }
  0xe8   :  { %v334_v41 = vpop.permute.xlu1 %333  ;;  %v330_v42 = vpop.permute.xlu0 %329 }
  0xe9   :  { %v747_v43 = vmul.f32 %v334_v41, %v82_v36  ;;  %v746_v19 = vmul.f32 %v330_v42, %v81_v37  ;;  %v883_v29 = vadd.f32 %v882_v20, %v745_v31  ;;  %v853_v6 = vadd.f32 %v852_v62, %v725_v61  ;;  %v91_v31 = vld [vmem:[#allocation4 + $0x170] sm:$0xff]  ;;  %v94_v41 = vld [vmem:[#allocation4 + $0x188] sm:$0xff]  ;;  %v93_v42 = vld [vmem:[#allocation4 + $0x180] sm:$0xff] }
  0xea   :  { %581 = vbcast.lane.b32.xlu1 %v1268_v38, 256  ;;  %v878_v48 = vadd.f32 %v877_v40, %v876_v27 }
  0xeb   :  { %v884_v49 = vadd.f32 %v883_v29, %v746_v19  ;;  %585 = vbcast.lane.b32.xlu0 %v1268_v38, 264  ;;  %v854_v7 = vrot.slane %v853_v6, 4 }
  0xec   :  { %v342_v51 = vpop.permute.xlu1 %341  ;;  %v338_v28 = vpop.permute.xlu0 %337 }
  0xed   :  { %v749_v53 = vmul.f32 %v342_v51, %v84_v45  ;;  %v748_v54 = vmul.f32 %v338_v28, %v83_v46  ;;  %v885_v55 = vadd.f32 %v884_v49, %v747_v43  ;;  %v855_v33 = vadd.f32 %v854_v7, %v853_v6  ;;  %v96_v49 = vld [vmem:[#allocation4 + $0x198] sm:$0xff]  ;;  %v99_v6 = vld [vmem:[#allocation4 + $0x1b0] sm:$0xff] }
  0xee   :  { %522 = vbcast.lane.b32.xlu1 %v1261_v24, 272 }
  0xef   :  { %v886_v60 = vadd.f32 %v885_v55, %v748_v54  ;;  %648 = vbcast.lane.b32.xlu0 %v1276_v56, 256  ;;  %v856_v19 = vrot.slane %v855_v33, 2 }
  0xf0   :  { %v350_v63 = vpop.permute.xlu1 %349  ;;  %v346_v0 = vpop.permute.xlu0 %345 }
  0xf1   :  { %v751_v2 = vmul.f32 %v350_v63, %v86_v58  ;;  %v750_v21 = vmul.f32 %v346_v0, %v85_v59  ;;  %v887_v3 = vadd.f32 %v886_v60, %v749_v53  ;;  %v857_v52 = vadd.f32 %v856_v19, %v855_v33  ;;  %v98_v59 = vld [vmem:[#allocation4 + $0x1a8] sm:$0xff]  ;;  %v97_v60 = vld [vmem:[#allocation4 + $0x1a0] sm:$0xff]  ;;  %v104_v33 = vld [vmem:[#allocation4 + $0x1d8] sm:$0xff] }
  0xf2   :  { %652 = vbcast.lane.b32.xlu1 %v1276_v56, 264  ;;  %v879_v58 = vrot.slane %v878_v48, 1 }
  0xf3   :  { %v888_v22 = vadd.f32 %v887_v3, %v750_v21  ;;  %589 = vbcast.lane.b32.xlu0 %v1268_v38, 272  ;;  %v858_v63 = vrot.slane %v857_v52, 1 }
  0xf4   :  { %v358_v8 = vpop.permute.xlu1 %357  ;;  %v354_v9 = vpop.permute.xlu0 %353 }
  0xf5   :  { %v753_v10 = vmul.f32 %v358_v8, %v88_v35  ;;  %v752_v34 = vmul.f32 %v354_v9, %v87_v5  ;;  %v889_v11 = vadd.f32 %v888_v22, %v751_v2  ;;  %v880_v5 = vadd.f32 %v879_v58, %v878_v48  ;;  %v100_v22 = vld [vmem:[#allocation4 + $0x1b8] sm:$0xff] }
  0xf6   :  { %526 = vbcast.lane.b32.xlu1 %v1261_v24, 280  ;;  %v108_v48 = vld [vmem:[#allocation4 + $0x1f8] sm:$0xff] }
  0xf7   :  { %v890_v15 = vadd.f32 %v889_v11, %v752_v34  ;;  %656 = vbcast.lane.b32.xlu0 %v1276_v56, 272 }
  0xf8   :  { %v366_v16 = vpop.permute.xlu1 %365  ;;  %v362_v17 = vpop.permute.xlu0 %361 }
  0xf9   :  { %v755_v25 = vmul.f32 %v366_v16, %v90_v13  ;;  %v754_v26 = vmul.f32 %v362_v17, %v89_v14  ;;  %v891_v23 = vadd.f32 %v890_v15, %v753_v10  ;;  %v859_v10 = vadd.f32 %v858_v63, %v857_v52  ;;  %v102_v16 = vld [vmem:[#allocation4 + $0x1c8] sm:$0xff]  ;;  %v101_v17 = vld [vmem:[#allocation4 + $0x1c0] sm:$0xff]  ;;  %v111_v63 = vld [vmem:[#allocation4 + $0x210] sm:$0xff] }
  0xfa   :  { %593 = vbcast.lane.b32.xlu1 %v1268_v38, 280 }
  0xfb   :  { %v892_v32 = vadd.f32 %v891_v23, %v754_v26  ;;  %530 = vbcast.lane.b32.xlu0 %v1261_v24, 288  ;;  %v1016_v7 = vsel %vm1015_vm1, %v880_v5, %v859_v10  ;;  %v113_v10 = vld [vmem:[#allocation4 + $0x220] sm:$0xff] }
  0xfc   :  { %v374_v36 = vpop.permute.xlu1 %373  ;;  %v370_v37 = vpop.permute.xlu0 %369 }
  0xfd   :  { %v757_v39 = vmul.f32 %v374_v36, %v92_v30  ;;  %v756_v20 = vmul.f32 %v370_v37, %v91_v31  ;;  %v893_v18 = vadd.f32 %v892_v32, %v755_v25  ;;  %v103_v36 = vld [vmem:[#allocation4 + $0x1d0] sm:$0xff] }
  0xfe   :  { %660 = vbcast.lane.b32.xlu1 %v1276_v56, 280 }
  0xff   :  { %v894_v43 = vadd.f32 %v893_v18, %v756_v20  ;;  %597 = vbcast.lane.b32.xlu0 %v1268_v38, 288 }
 0x100   :  { %v385_v29 = vpop.permute.xlu1 %384  ;;  %v381_v44 = vpop.permute.xlu0 %380 }
 0x101   :  { %v895_v45 = vadd.f32 %v894_v43, %v757_v39  ;;  %v759_v46 = vmul.f32 %v385_v29, %v94_v41  ;;  %v758_v47 = vmul.f32 %v381_v44, %v93_v42  ;;  %v106_v42 = vld [vmem:[#allocation4 + $0x1e8] sm:$0xff]  ;;  %v105_v43 = vld [vmem:[#allocation4 + $0x1e0] sm:$0xff] }
 0x102   :  { %534 = vbcast.lane.b32.xlu1 %v1261_v24, 296 }
 0x103   :  { %v896_v51 = vrot.slane %v895_v45, 4  ;;  %v902_v28 = vadd.f32 %v759_v46, %v758_v47  ;;  %664 = vbcast.lane.b32.xlu0 %v1276_v56, 288 }
 0x104   :  { %v393_v53 = vpop.permute.xlu1 %392  ;;  %v389_v54 = vpop.permute.xlu0 %388 }
 0x105   :  { %v897_v55 = vadd.f32 %v896_v51, %v895_v45  ;;  %v761_v1 = vmul.f32 %v393_v53, %v96_v49  ;;  %v760_v57 = vmul.f32 %v389_v54, %v95_v50  ;;  %v107_v49 = vld [vmem:[#allocation4 + $0x1f0] sm:$0xff] }
 0x106   :  { %601 = vbcast.lane.b32.xlu1 %v1268_v38, 296 }
 0x107   :  { %v898_v61 = vrot.slane %v897_v55, 2  ;;  %v903_v62 = vadd.f32 %v902_v28, %v760_v57  ;;  %538 = vbcast.lane.b32.xlu0 %v1261_v24, 304 }
 0x108   :  { %v401_v0 = vpop.permute.xlu1 %400  ;;  %v397_v2 = vpop.permute.xlu0 %396 }
 0x109   :  { %v899_v21 = vadd.f32 %v898_v61, %v897_v55  ;;  %v763_v3 = vmul.f32 %v401_v0, %v98_v59  ;;  %v762_v4 = vmul.f32 %v397_v2, %v97_v60  ;;  %v904_v35 = vadd.f32 %v903_v62, %v761_v1  ;;  %v110_v55 = vld [vmem:[#allocation4 + $0x208] sm:$0xff]  ;;  %v109_v1 = vld [vmem:[#allocation4 + $0x200] sm:$0xff] }
 0x10a   :  { %668 = vbcast.lane.b32.xlu1 %v1276_v56, 296 }
 0x10b   :  { %v900_v8 = vrot.slane %v899_v21, 1  ;;  %v905_v9 = vadd.f32 %v904_v35, %v762_v4  ;;  %605 = vbcast.lane.b32.xlu0 %v1268_v38, 304  ;;  %v112_v35 = vld [vmem:[#allocation4 + $0x218] sm:$0xff] }
 0x10c   :  { %v409_v34 = vpop.permute.xlu1 %408  ;;  %v405_v11 = vpop.permute.xlu0 %404 }
 0x10d   :  { %v901_v12 = vadd.f32 %v900_v8, %v899_v21  ;;  %v765_v13 = vmul.f32 %v409_v34, %v100_v22  ;;  %v764_v14 = vmul.f32 %v405_v11, %v99_v6  ;;  %v906_v15 = vadd.f32 %v905_v9, %v763_v3 }
 0x10e   :  { %542 = vbcast.lane.b32.xlu1 %v1261_v24, 312 }
 0x10f   :  { %v1299_v25 = vsel %vm1017_vm2, %v901_v12, %v1016_v7  ;;  %v907_v26 = vadd.f32 %v906_v15, %v764_v14  ;;  %672 = vbcast.lane.b32.xlu0 %v1276_v56, 304  ;;  %v114_v15 = vld [vmem:[#allocation4 + $0x228] sm:$0xff] }
 0x110   :  { %v417_v23 = vpop.permute.xlu1 %416  ;;  %v413_v27 = vpop.permute.xlu0 %412 }
 0x111   :  { %v767_v30 = vmul.f32 %v417_v23, %v102_v16  ;;  %v766_v31 = vmul.f32 %v413_v27, %v101_v17  ;;  %v908_v32 = vadd.f32 %v907_v26, %v765_v13  ;;  %v115_v23 = vld [vmem:[#allocation4 + $0x230] sm:$0xff] }
 0x112   :  { %609 = vbcast.lane.b32.xlu1 %v1268_v38, 312 }
 0x113   :  { %v909_v37 = vadd.f32 %v908_v32, %v766_v31  ;;  %546 = vbcast.lane.b32.xlu0 %v1261_v24, 320  ;;  %v116_v32 = vld [vmem:[#allocation4 + $0x238] sm:$0xff] }
 0x114   :  { %v425_v39 = vpop.permute.xlu1 %424  ;;  %v421_v20 = vpop.permute.xlu0 %420 }
 0x115   :  { %v769_v18 = vmul.f32 %v425_v39, %v104_v33  ;;  %v768_v40 = vmul.f32 %v421_v20, %v103_v36  ;;  %v910_v41 = vadd.f32 %v909_v37, %v767_v30 }
 0x116   :  { %676 = vbcast.lane.b32.xlu1 %v1276_v56, 312 }
 0x117   :  { %v911_v19 = vadd.f32 %v910_v41, %v768_v40  ;;  %613 = vbcast.lane.b32.xlu0 %v1268_v38, 320  ;;  %v118_v40 = vld [vmem:[#allocation4 + $0x248] sm:$0xff] }
 0x118   :  { %v433_v29 = vpop.permute.xlu1 %432  ;;  %v429_v44 = vpop.permute.xlu0 %428 }
 0x119   :  { %v771_v45 = vmul.f32 %v433_v29, %v106_v42  ;;  %v770_v46 = vmul.f32 %v429_v44, %v105_v43  ;;  %v912_v47 = vadd.f32 %v911_v19, %v769_v18 }
 0x11a   :  { %550 = vbcast.lane.b32.xlu1 %v1261_v24, 328 }
 0x11b   :  { %v913_v50 = vadd.f32 %v912_v47, %v770_v46  ;;  %680 = vbcast.lane.b32.xlu0 %v1276_v56, 320 }
 0x11c   :  { %v441_v51 = vpop.permute.xlu1 %440  ;;  %v437_v28 = vpop.permute.xlu0 %436 }
 0x11d   :  { %v773_v52 = vmul.f32 %v441_v51, %v108_v48  ;;  %v772_v53 = vmul.f32 %v437_v28, %v107_v49  ;;  %v914_v54 = vadd.f32 %v913_v50, %v771_v45  ;;  %v1032_v48 = vld [vmem:[#allocation3] sm:$0xff]  ;;  %v119_v28 = vld [vmem:[#allocation4 + $0x250] sm:$0xff] }
 0x11e   :  { %617 = vbcast.lane.b32.xlu1 %v1268_v38, 328 }
 0x11f   :  { %v915_v57 = vadd.f32 %v914_v54, %v772_v53  ;;  %554 = vbcast.lane.b32.xlu0 %v1261_v24, 336  ;;  %v121_v53 = vld [vmem:[#allocation4 + $0x260] sm:$0xff] }
 0x120   :  { %v452_v58 = vpop.permute.xlu1 %451  ;;  %v448_v59 = vpop.permute.xlu0 %447 }
 0x121   :  { %v916_v60 = vadd.f32 %v915_v57, %v773_v52  ;;  %v775_v61 = vmul.f32 %v452_v58, %v110_v55  ;;  %v774_v62 = vmul.f32 %v448_v59, %v109_v1  ;;  %v122_v1 = vld [vmem:[#allocation4 + $0x268] sm:$0xff]  ;;  %v123_v59 = vld [vmem:[#allocation4 + $0x270] sm:$0xff] }
 0x122   :  { %684 = vbcast.lane.b32.xlu1 %v1276_v56, 328 }
 0x123   :  { %v917_v0 = vrot.slane %v916_v60, 4  ;;  %v923_v2 = vadd.f32 %v775_v61, %v774_v62  ;;  %621 = vbcast.lane.b32.xlu0 %v1268_v38, 336 }
 0x124   :  { %v456_v21 = vpop.permute.xlu1 %455 }
 0x125   :  { %v918_v3 = vadd.f32 %v917_v0, %v916_v60  ;;  %v776_v4 = vmul.f32 %v456_v21, %v111_v63  ;;  %v124_v63 = vld [vmem:[#allocation4 + $0x278] sm:$0xff] }
 0x126   :  { %558 = vbcast.lane.b32.xlu1 %v1261_v24, 344 }
 0x127   :  { %v919_v5 = vrot.slane %v918_v3, 2  ;;  %v924_v22 = vadd.f32 %v923_v2, %v776_v4  ;;  %688 = vbcast.lane.b32.xlu0 %v1276_v56, 336 }
 0x128   :  { %v460_v6 = vpop.permute.xlu1 %459 }
 0x129   :  { %v920_v8 = vadd.f32 %v919_v5, %v918_v3  ;;  %v777_v9 = vmul.f32 %v460_v6, %v112_v35 }
 0x12a   :  { %625 = vbcast.lane.b32.xlu1 %v1268_v38, 344 }
 0x12b   :  { %v921_v34 = vrot.slane %v920_v8, 1  ;;  %v925_v11 = vadd.f32 %v924_v22, %v777_v9  ;;  %562 = vbcast.lane.b32.xlu0 %v1261_v24, 352 }
 0x12c   :  { %v464_v12 = vpop.permute.xlu1 %463 }
 0x12d   :  { %v922_v13 = vadd.f32 %v921_v34, %v920_v8  ;;  %v778_v14 = vmul.f32 %v464_v12, %v113_v10 }
 0x12e   :  { %692 = vbcast.lane.b32.xlu1 %v1276_v56, 344 }
 0x12f   :  { %v926_v7 = vadd.f32 %v925_v11, %v778_v14  ;;  %629 = vbcast.lane.b32.xlu0 %v1268_v38, 352  ;;  %v1319_v16 = vsel %vm1019_vm3, %v922_v13, %v1299_v25  ;;  %v117_v25 = vld [vmem:[#allocation4 + $0x240] sm:$0xff] }
 0x130   :  { %v468_v17 = vpop.permute.xlu1 %467 }
 0x131   :  { %v779_v26 = vmul.f32 %v468_v17, %v114_v15 }
 0x132   :  { %566 = vbcast.lane.b32.xlu1 %v1261_v24, 360 }
 0x133   :  { %v927_v27 = vadd.f32 %v926_v7, %v779_v26  ;;  %696 = vbcast.lane.b32.xlu0 %v1276_v56, 352 }
 0x134   :  { %v472_v30 = vpop.permute.xlu1 %471 }
 0x135   :  { %v780_v31 = vmul.f32 %v472_v30, %v115_v23 }
 0x136   :  { %633 = vbcast.lane.b32.xlu1 %v1268_v38, 360 }
 0x137   :  { %v928_v33 = vadd.f32 %v927_v27, %v780_v31  ;;  %570 = vbcast.lane.b32.xlu0 %v1261_v24, 368 }
 0x138   :  { %v476_v36 = vpop.permute.xlu1 %475 }
 0x139   :  { %v781_v37 = vmul.f32 %v476_v36, %v116_v32 }
 0x13a   :  { %700 = vbcast.lane.b32.xlu1 %v1276_v56, 360 }
 0x13b   :  { %v929_v39 = vadd.f32 %v928_v33, %v781_v37  ;;  %637 = vbcast.lane.b32.xlu0 %v1268_v38, 368 }
 0x13c   :  { %v480_v20 = vpop.permute.xlu1 %479 }
 0x13d   :  { %v782_v18 = vmul.f32 %v480_v20, %v117_v25  ;;  %v126_v20 = vld [vmem:[#allocation4 + $0x288] sm:$0xff] }
 0x13e   :  { %574 = vbcast.lane.b32.xlu1 %v1261_v24, 376  ;;  %v120_v24 = vld [vmem:[#allocation4 + $0x258] sm:$0xff] }
 0x13f   :  { %v930_v41 = vadd.f32 %v929_v39, %v782_v18  ;;  %704 = vbcast.lane.b32.xlu0 %v1276_v56, 368  ;;  %v125_v39 = vld [vmem:[#allocation4 + $0x280] sm:$0xff] }
 0x140   :  { %v484_v42 = vpop.permute.xlu1 %483 }
 0x141   :  { %v783_v43 = vmul.f32 %v484_v42, %v118_v40 }
 0x142   :  { %641 = vbcast.lane.b32.xlu1 %v1268_v38, 376 }
 0x143   :  { %v931_v19 = vadd.f32 %v930_v41, %v783_v43  ;;  %v127_v43 = vld [vmem:[#allocation4 + $0x290] sm:$0xff] }
 0x144   :  { %v492_v29 = vpop.permute.xlu1 %491 }
 0x145   :  { %v785_v54 = vmul.f32 %v492_v29, %v120_v24 }
 0x146   :  { %708 = vbcast.lane.b32.xlu1 %v1276_v56, 376 }
 0x148   :  { %v496_v44 = vpop.permute.xlu1 %495 }
 0x149   :  { %v786_v57 = vmul.f32 %v496_v44, %v121_v53 }
 0x14c   :  { %v500_v45 = vpop.permute.xlu1 %499 }
 0x14d   :  { %v787_v61 = vmul.f32 %v500_v45, %v122_v1  ;;  %v128_v45 = vld [vmem:[#allocation4 + $0x298] sm:$0xff] }
 0x150   :  { %v504_v46 = vpop.permute.xlu1 %503 }
 0x151   :  { %v788_v21 = vmul.f32 %v504_v46, %v123_v59 }
 0x154   :  { %v508_v47 = vpop.permute.xlu1 %507 }
 0x155   :  { %v789_v5 = vmul.f32 %v508_v47, %v124_v63 }
 0x158   :  { %v515_v49 = vpop.permute.xlu1 %514 }
 0x159   :  { %v790_v41 = vmul.f32 %v515_v49, %v125_v39 }
 0x15a   :  { %v1034_v50 = vpop.xlane.xlu0 %1033 }
 0x15b   :  { %v1035_v51 = vadd.f32 %v1034_v50, %v1032_v48 }
 0x15c   :  { %v1331_v52 = vpop.permute.xlu1 %581 }
 0x15d   :  { %1037 = vst.msk [vmem:[#allocation3] sm:$0xff] %vm43_vm0, %v1035_v51  ;;  %v129_v51 = vld [vmem:[#allocation4 + $0x2a0] sm:$0xff] }
 0x15e   :  { %v488_v38 = vpop.permute.xlu0 %487 }
 0x15f   :  { %v784_v55 = vmul.f32 %v488_v38, %v119_v28  ;;  %v130_v38 = vld [vmem:[#allocation4 + $0x2a8] sm:$0xff] }
 0x160   :  { %v523_v56 = vpop.permute.xlu1 %522 }
 0x161   :  { %v932_v58 = vadd.f32 %v931_v19, %v784_v55  ;;  %v792_v44 = vmul.f32 %v523_v56, %v127_v43  ;;  %v131_v56 = vld [vmem:[#allocation4 + $0x2b0] sm:$0xff] }
 0x162   :  { %v519_v60 = vpop.permute.xlu0 %518 }
 0x163   :  { %v933_v62 = vadd.f32 %v932_v58, %v785_v54  ;;  %v791_v42 = vmul.f32 %v519_v60, %v126_v20  ;;  %v159_v20 = vld [vmem:[#allocation4 + $0x390] sm:$0xff] }
 0x164   :  { %v1041_v0 = vld [vmem:[#allocation3] sm:$0xff]  ;;  %v1334_v2 = vpop.permute.xlu1 %652 }
 0x165   :  { %v934_v3 = vadd.f32 %v933_v62, %v786_v57  ;;  %v1042_v4 = vmax.f32 %v1041_v0, 1e-09  ;;  %v132_v62 = vld [vmem:[#allocation4 + $0x2b8] sm:$0xff]  ;;  %v133_v0 = vld [vmem:[#allocation4 + $0x2c0] sm:$0xff] }
 0x166   :  { %v1336_v35 = vpop.permute.xlu0 %585 }
 0x167   :  { %v935_v22 = vadd.f32 %v934_v3, %v787_v61  ;;  %1046 = vperm.xlu0 %1075, %v1042_v4   ;;  %v141_v3 = vld [vmem:[#allocation4 + $0x300] sm:$0xff]  ;;  %v142_v4 = vld [vmem:[#allocation4 + $0x308] sm:$0xff] }
 0x168   :  { %v527_v6 = vpop.permute.xlu1 %526 }
 0x169   :  { %v936_v8 = vadd.f32 %v935_v22, %v788_v21  ;;  %v793_v50 = vmul.f32 %v527_v6, %v128_v45  ;;  %v158_v6 = vld [vmem:[#allocation4 + $0x388] sm:$0xff] }
 0x16a   :  { %v1338_v9 = vpop.permute.xlu0 %648 }
 0x16b   :  { %v937_v10 = vadd.f32 %v936_v8, %v789_v5  ;;  %v157_v8 = vld [vmem:[#allocation4 + $0x380] sm:$0xff] }
 0x16c   :  { %v1340_v34 = vpop.permute.xlu1 %593 }
 0x16d   :  { %v938_v11 = vrot.slane %v937_v10, 4 }
 0x16e   :  { %v1342_v12 = vpop.permute.xlu0 %589 }
 0x16f   :  { %v939_v13 = vadd.f32 %v938_v11, %v937_v10 }
 0x170   :  { %v1344_v14 = vpop.permute.xlu1 %660 }
 0x171   :  { %v940_v15 = vrot.slane %v939_v13, 2 }
 0x172   :  { %v1346_v7 = vpop.permute.xlu0 %656 }
 0x173   :  { %v941_v17 = vadd.f32 %v940_v15, %v939_v13  ;;  %v806_v13 = vmul.f32 %v1331_v52, %v141_v3  ;;  %v807_v15 = vmul.f32 %v1336_v35, %v142_v4  ;;  %v824_v45 = vmul.f32 %v1346_v7, %v159_v20  ;;  %v146_v4 = vld [vmem:[#allocation4 + $0x328] sm:$0xff] }
 0x174   :  { %v535_v26 = vpop.permute.xlu1 %534 }
 0x175   :  { %v942_v23 = vrot.slane %v941_v17, 1  ;;  %v795_v57 = vmul.f32 %v535_v26, %v130_v38  ;;  %v965_v43 = vadd.f32 %v807_v15, %v806_v13  ;;  %v139_v15 = vld [vmem:[#allocation4 + $0x2f0] sm:$0xff] }
 0x176   :  { %v531_v27 = vpop.permute.xlu0 %530 }
 0x177   :  { %v943_v30 = vadd.f32 %v942_v23, %v941_v17  ;;  %v794_v49 = vmul.f32 %v531_v27, %v129_v51  ;;  %v134_v17 = vld [vmem:[#allocation4 + $0x2c8] sm:$0xff]  ;;  %v823_v23 = vmul.f32 %v1334_v2, %v158_v6  ;;  %v822_v27 = vmul.f32 %v1338_v9, %v157_v8  ;;  %v160_v2 = vld [vmem:[#allocation4 + $0x398] sm:$0xff] }
 0x178   :  { %v1348_v31 = vpop.permute.xlu1 %601  ;;  %v162_v6 = vld [vmem:[#allocation4 + $0x3a8] sm:$0xff] }
 0x179   :  { %v1351_v32 = vsel %vm1021_vm4, %v943_v30, %v1319_v16  ;;  %v944_v16 = vadd.f32 %v791_v42, %v790_v41  ;;  %v143_v30 = vld [vmem:[#allocation4 + $0x310] sm:$0xff]  ;;  %v986_v35 = vadd.f32 %v823_v23, %v822_v27  ;;  %v811_v13 = vmul.f32 %v1348_v31, %v146_v4  ;;  %v140_v23 = vld [vmem:[#allocation4 + $0x2f8] sm:$0xff] }
 0x17a   :  { %v1353_v33 = vpop.permute.xlu0 %597  ;;  %v808_v52 = vmul.f32 %v1342_v12, %v143_v30  ;;  %v145_v12 = vld [vmem:[#allocation4 + $0x320] sm:$0xff]  ;;  %v147_v30 = vld [vmem:[#allocation4 + $0x330] sm:$0xff] }
 0x17b   :  { %v945_v48 = vadd.f32 %v944_v16, %v792_v44  ;;  %v144_v44 = vld [vmem:[#allocation4 + $0x318] sm:$0xff] }
 0x17c   :  { %v1355_v36 = vpop.permute.xlu1 %668 }
 0x17d   :  { %v946_v53 = vadd.f32 %v945_v48, %v793_v50  ;;  %v136_v50 = vld [vmem:[#allocation4 + $0x2d8] sm:$0xff]  ;;  %v827_v27 = vmul.f32 %v1355_v36, %v162_v6  ;;  %v153_v6 = vld [vmem:[#allocation4 + $0x360] sm:$0xff] }
 0x17e   :  { %v1357_v37 = vpop.permute.xlu0 %664 }
 0x17f   :  { %v947_v1 = vadd.f32 %v946_v53, %v794_v49  ;;  %v809_v53 = vmul.f32 %v1340_v34, %v144_v44  ;;  %v137_v49 = vld [vmem:[#allocation4 + $0x2e0] sm:$0xff]  ;;  %v164_v44 = vld [vmem:[#allocation4 + $0x3b8] sm:$0xff] }
 0x180   :  { %v543_v25 = vpop.permute.xlu1 %542 }
 0x181   :  { %v948_v60 = vadd.f32 %v947_v1, %v795_v57  ;;  %v797_v22 = vmul.f32 %v543_v25, %v132_v62  ;;  %v135_v25 = vld [vmem:[#allocation4 + $0x2d0] sm:$0xff]  ;;  %v825_v1 = vmul.f32 %v1344_v14, %v160_v2 }
 0x182   :  { %v539_v18 = vpop.permute.xlu0 %538 }
 0x183   :  { %v796_v61 = vmul.f32 %v539_v18, %v131_v56 }
 0x184   :  { %v1359_v40 = vpop.permute.xlu1 %609 }
 0x185   :  { %v949_v5 = vadd.f32 %v948_v60, %v796_v61  ;;  %v161_v60 = vld [vmem:[#allocation4 + $0x3a0] sm:$0xff] }
 0x186   :  { %v1361_v19 = vpop.permute.xlu0 %605 }
 0x187   :  { %v950_v39 = vadd.f32 %v949_v5, %v797_v22  ;;  %v826_v5 = vmul.f32 %v1357_v37, %v161_v60 }
 0x188   :  { %v1363_v29 = vpop.permute.xlu1 %676 }
 0x18a   :  { %v1365_v46 = vpop.permute.xlu0 %672 }
 0x18c   :  { %v551_v47 = vpop.permute.xlu1 %550 }
 0x18d   :  { %v799_v42 = vmul.f32 %v551_v47, %v134_v17  ;;  %v987_v47 = vadd.f32 %v986_v35, %v824_v45  ;;  %v149_v45 = vld [vmem:[#allocation4 + $0x340] sm:$0xff] }
 0x18e   :  { %v547_v24 = vpop.permute.xlu0 %546 }
 0x18f   :  { %v798_v11 = vmul.f32 %v547_v24, %v133_v0  ;;  %v966_v24 = vadd.f32 %v965_v43, %v808_v52  ;;  %v138_v0 = vld [vmem:[#allocation4 + $0x2e8] sm:$0xff]  ;;  %v988_v34 = vadd.f32 %v987_v47, %v825_v1  ;;  %v812_v43 = vmul.f32 %v1361_v19, %v147_v30 }
 0x190   :  { %v1367_v28 = vpop.permute.xlu1 %617 }
 0x191   :  { %v951_v41 = vadd.f32 %v950_v39, %v798_v11  ;;  %v967_v62 = vadd.f32 %v966_v24, %v809_v53  ;;  %v163_v39 = vld [vmem:[#allocation4 + $0x3b0] sm:$0xff] }
 0x192   :  { %v1369_v54 = vpop.permute.xlu0 %613  ;;  %v828_v35 = vmul.f32 %v1365_v46, %v163_v39  ;;  %v166_v46 = vld [vmem:[#allocation4 + $0x3c8] sm:$0xff] }
 0x193   :  { %v952_v51 = vadd.f32 %v951_v41, %v799_v42  ;;  %v814_v53 = vmul.f32 %v1369_v54, %v149_v45  ;;  %v152_v54 = vld [vmem:[#allocation4 + $0x358] sm:$0xff] }
 0x194   :  { %v1371_v55 = vpop.permute.xlu1 %684 }
 0x196   :  { %v1373_v58 = vpop.permute.xlu0 %680 }
 0x198   :  { %v559_v59 = vpop.permute.xlu1 %558 }
 0x199   :  { %v801_v56 = vmul.f32 %v559_v59, %v136_v50  ;;  %v165_v50 = vld [vmem:[#allocation4 + $0x3c0] sm:$0xff] }
 0x19a   :  { %v555_v63 = vpop.permute.xlu0 %554  ;;  %v830_v19 = vmul.f32 %v1373_v58, %v165_v50 }
 0x19b   :  { %v800_v48 = vmul.f32 %v555_v63, %v135_v25  ;;  %v810_v63 = vmul.f32 %v1353_v33, %v145_v12  ;;  %v989_v33 = vadd.f32 %v988_v34, %v826_v5  ;;  %v168_v5 = vld [vmem:[#allocation4 + $0x3d8] sm:$0xff] }
 0x19c   :  { %v1375_v21 = vpop.permute.xlu1 %625 }
 0x19d   :  { %v953_v57 = vadd.f32 %v952_v51, %v800_v48  ;;  %v968_v11 = vadd.f32 %v967_v62, %v810_v63  ;;  %v990_v52 = vadd.f32 %v989_v33, %v827_v27  ;;  %v829_v51 = vmul.f32 %v1363_v29, %v164_v44  ;;  %v170_v27 = vld [vmem:[#allocation4 + $0x3e8] sm:$0xff] }
 0x19e   :  { %v1377_v10 = vpop.permute.xlu0 %621  ;;  %v831_v63 = vmul.f32 %v1371_v55, %v166_v46 }
 0x19f   :  { %v954_v22 = vadd.f32 %v953_v57, %v801_v56  ;;  %v969_v42 = vadd.f32 %v968_v11, %v811_v13  ;;  %v151_v57 = vld [vmem:[#allocation4 + $0x350] sm:$0xff]  ;;  %v169_v11 = vld [vmem:[#allocation4 + $0x3e0] sm:$0xff] }
 0x1a0   :  { %v1381_v26 = vpop.permute.xlu1 %692 }
 0x1a1   :  { %v970_v2 = vadd.f32 %v969_v42, %v812_v43  ;;  %v833_v55 = vmul.f32 %v1381_v26, %v168_v5 }
 0x1a2   :  { %v1385_v18 = vpop.permute.xlu0 %688 }
 0x1a4   :  { %v567_v16 = vpop.permute.xlu1 %566 }
 0x1a5   :  { %v803_v59 = vmul.f32 %v567_v16, %v138_v0  ;;  %v148_v16 = vld [vmem:[#allocation4 + $0x338] sm:$0xff]  ;;  %v816_v0 = vmul.f32 %v1377_v10, %v151_v57 }
 0x1a6   :  { %v563_v9 = vpop.permute.xlu0 %562  ;;  %v813_v36 = vmul.f32 %v1359_v40, %v148_v16  ;;  %v167_v40 = vld [vmem:[#allocation4 + $0x3d0] sm:$0xff] }
 0x1a7   :  { %v802_v7 = vmul.f32 %v563_v9, %v137_v49  ;;  %v991_v9 = vadd.f32 %v990_v52, %v828_v35  ;;  %v150_v49 = vld [vmem:[#allocation4 + $0x348] sm:$0xff]  ;;  %v832_v34 = vmul.f32 %v1385_v18, %v167_v40  ;;  %v172_v35 = vld [vmem:[#allocation4 + $0x3f8] sm:$0xff] }
 0x1a8   :  { %v1390_v38 = vpop.permute.xlu1 %633  ;;  %v971_v1 = vadd.f32 %v970_v2, %v813_v36  ;;  %v154_v18 = vld [vmem:[#allocation4 + $0x368] sm:$0xff] }
 0x1a9   :  { %v955_v8 = vadd.f32 %v954_v22, %v802_v7  ;;  %v992_v12 = vadd.f32 %v991_v9, %v829_v51  ;;  %v815_v7 = vmul.f32 %v1367_v28, %v150_v49  ;;  %v817_v28 = vmul.f32 %v1375_v21, %v152_v54 }
 0x1aa   :  { %v1393_v61 = vpop.permute.xlu0 %629  ;;  %v972_v60 = vadd.f32 %v971_v1, %v814_v53  ;;  %v819_v21 = vmul.f32 %v1390_v38, %v154_v18 }
 0x1ab   :  { %v956_v25 = vadd.f32 %v955_v8, %v803_v59  ;;  %v993_v62 = vadd.f32 %v992_v12, %v830_v19 }
 0x1ac   :  { %v1396_v3 = vpop.permute.xlu1 %700  ;;  %v973_v4 = vadd.f32 %v972_v60, %v815_v7 }
 0x1ad   :  { %v994_v22 = vadd.f32 %v993_v62, %v831_v63  ;;  %v835_v26 = vmul.f32 %v1396_v3, %v170_v27 }
 0x1ae   :  { %v1399_v14 = vpop.permute.xlu0 %696  ;;  %v974_v59 = vadd.f32 %v973_v4, %v816_v0 }
 0x1b0   :  { %v575_v17 = vpop.permute.xlu1 %574  ;;  %v975_v33 = vadd.f32 %v974_v59, %v817_v28 }
 0x1b1   :  { %v805_v41 = vmul.f32 %v575_v17, %v140_v23  ;;  %v818_v17 = vmul.f32 %v1393_v61, %v153_v6  ;;  %v834_v23 = vmul.f32 %v1399_v14, %v169_v11 }
 0x1b2   :  { %v571_v20 = vpop.permute.xlu0 %570 }
 0x1b3   :  { %v804_v37 = vmul.f32 %v571_v20, %v139_v15  ;;  %v995_v15 = vadd.f32 %v994_v22, %v832_v34  ;;  %v155_v20 = vld [vmem:[#allocation4 + $0x370] sm:$0xff] }
 0x1b4   :  { %v642_v30 = vpop.permute.xlu1 %641 }
 0x1b5   :  { %v957_v31 = vadd.f32 %v956_v25, %v804_v37  ;;  %v996_v39 = vadd.f32 %v995_v15, %v833_v55  ;;  %v976_v25 = vadd.f32 %v975_v33, %v818_v17 }
 0x1b6   :  { %v638_v13 = vpop.permute.xlu0 %637 }
 0x1b7   :  { %v958_v48 = vadd.f32 %v957_v31, %v805_v41  ;;  %v171_v41 = vld [vmem:[#allocation4 + $0x3f0] sm:$0xff]  ;;  %v997_v42 = vadd.f32 %v996_v39, %v834_v23  ;;  %v820_v43 = vmul.f32 %v638_v13, %v155_v20  ;;  %v977_v61 = vadd.f32 %v976_v25, %v819_v21 }
 0x1b8   :  { %v709_v16 = vpop.permute.xlu1 %708 }
 0x1b9   :  { %v959_v24 = vrot.slane %v958_v48, 4  ;;  %v998_v14 = vadd.f32 %v997_v42, %v835_v26  ;;  %v978_v31 = vadd.f32 %v977_v61, %v820_v43 }
 0x1ba   :  { %v705_v37 = vpop.permute.xlu0 %704 }
 0x1bb   :  { %v960_v47 = vadd.f32 %v959_v24, %v958_v48  ;;  %v836_v52 = vmul.f32 %v705_v37, %v171_v41  ;;  %v837_v48 = vmul.f32 %v709_v16, %v172_v35 }
 0x1bd   :  { %v961_v56 = vrot.slane %v960_v47, 2  ;;  %v999_v45 = vadd.f32 %v998_v14, %v836_v52 }
 0x1bf   :  { %v962_v29 = vadd.f32 %v961_v56, %v960_v47  ;;  %v1000_v36 = vadd.f32 %v999_v45, %v837_v48 }
 0x1c1   :  { %v963_v58 = vrot.slane %v962_v29, 1  ;;  %v1001_v38 = vrot.slane %v1000_v36, 4 }
 0x1c3   :  { %v964_v8 = vadd.f32 %v963_v58, %v962_v29  ;;  %v1002_v51 = vadd.f32 %v1001_v38, %v1000_v36 }
 0x1c5   :  { %v1024_v10 = vsel %vm1023_vm5, %v964_v8, %v1351_v32  ;;  %v156_v32 = vld [vmem:[#allocation4 + $0x378] sm:$0xff]  ;;  %v1003_v53 = vrot.slane %v1002_v51, 2 }
 0x1c6   :  { %v821_v44 = vmul.f32 %v642_v30, %v156_v32 }
 0x1c7   :  { %v1004_v49 = vadd.f32 %v1003_v53, %v1002_v51 }
 0x1c8   :  { %v979_v2 = vadd.f32 %v978_v31, %v821_v44 }
 0x1c9   :  { %v1005_v1 = vrot.slane %v1004_v49, 1 }
 0x1ca   :  { %v980_v50 = vrot.slane %v979_v2, 4 }
 0x1cb   :  { %v1006_v12 = vadd.f32 %v1005_v1, %v1004_v49 }
 0x1cc   :  { %v981_v9 = vadd.f32 %v980_v50, %v979_v2 }
 0x1ce   :  { %v982_v24 = vrot.slane %v981_v9, 2 }
 0x1d0   :  { %v983_v3 = vadd.f32 %v982_v24, %v981_v9 }
 0x1d2   :  { %v984_v47 = vrot.slane %v983_v3, 1 }
 0x1d4   :  { %v985_v46 = vadd.f32 %v984_v47, %v983_v3 }
 0x1d6   :  { %v1026_v57 = vsel %vm1025_vm6, %v985_v46, %v1024_v10 }
 0x1d7   :  { %v1028_v60 = vsel %vm1027_vm7, %v1006_v12, %v1026_v57 }
 0x1e6   :  { %v1047_v19 = vpop.permute.xlu0 %1046 }
 0x1e7   :  { %1076 = vrcp.f32 %v1047_v19 }
 0x1f1   :  { %v1077_v56 = vpop.eup %1076 }
 0x1f2   :  { %v1050_v7 = vmul.f32 %v1077_v56, %v1028_v60 }
 0x1f4   :  { %1051 = vst [vmem:[#allocation9] sm:$0xff] %v1050_v7 }
 0x1f5   :  { %1133 = shalt.err (!%p1130_p6)
}
 0x1f6   :  { %s1134_s10 = scalar_lea.hbm %s1434_s2, 128 }
 0x1f7   :  { %p1135_p7 = scmp.ne.s32.totalorder %s1434_s2, %s1134_s10  ;;  %p1138_p8 = scmp.lt.u32.totalorder %s1134_s10, %s1434_s2 }
 0x1f9   :  { %p1140_p9 = pnand %p1138_p8, %p1135_p7 }
 0x1fb   :  { %1143 = shalt.err (!%p1140_p9)
}
 0x1fc   :  { %1061 = dma.vmem_to_hbm [thread:$0]  %s1059_s6, 128, %s1434_s2, [#allocation6]  }
 0x1fd   :  { %1148 = dma.done.wait [#allocation6], 128  }
 0x1fe   :  { %1149 = vsyncadd [#allocation6], 4294967168 }
 0x1ff   :  { %1065 = vsyncpa [#allocation5], 1 }
 0x200   :  { %1066 = vsyncpa [#allocation8], 1 }
 0x201   :  { %1067 = vsyncpa [#allocation6], 1 }

</bundles_post_ra>
